<compile_context>
chip_gen: v6e
topology: v6e:2x2x1
jax: 0.10.0
libtpu: 0.0.40
codegen_flags: <defaults>
</compile_context>

<pallas_src>
import jax
import jax.numpy as jnp
from jax.experimental import pallas as pl
from jax.experimental.pallas import tpu as pltpu

BN_EPS = 1e-5


def _round_up(x, m):
    return ((x + m - 1) // m) * m


def ignore_linear_kernel(x_ref, w_ref, gamma_ref, beta_ref, o_ref):
    # Matmul on the original (TN, dim_in) weight tile: contract dim_in of both.
    # f32 accumulation on the MXU.
    y = jax.lax.dot_general(
        x_ref[...], w_ref[...],
        dimension_numbers=(((1,), (1,)), ((), ())),
        preferred_element_type=jnp.float32,
    )  # (N, TN) float32

    # Linear bias intentionally omitted: cancelled by the BN mean subtraction.

    # BatchNorm1d (training mode): per-feature batch mean / biased variance,
    # all BN arithmetic in f32 (v5e has no bf16 VPU/EUP path).
    mean = jnp.mean(y, axis=0, keepdims=True)
    diff = y - mean
    var = jnp.mean(diff * diff, axis=0, keepdims=True)

    # Fold gamma into inv_std on the small (1, TN) row before broadcasting.
    scale = jax.lax.rsqrt(var + BN_EPS) * gamma_ref[...]
    o_ref[...] = (diff * scale + beta_ref[...]).astype(o_ref.dtype)


def ignore_linear(t, x, weight, bias, gamma, beta, *, tn=256, matmul_dtype=None):
    """Forward of IgnoreLinear: bn(linear(x)); `t` is ignored (kept for parity).

    weight: (dim_out, dim_in) PyTorch layout (NOT transposed by the wrapper).
    bias:   accepted for signature parity; mathematically a no-op under training-mode BN.
    tn:     feature-tile width (multiple of 128). ~128-256 for v5e, 512-1024 for v6e,
            roughly half the v6e choice for v7x's 64 MiB VMEM.
    matmul_dtype: optionally cast x/W to bf16 for the MXU on v6e/v7x (f32 accumulate,
            f32 BN). Default None keeps the input dtype.
    """
    del t, bias
    n, dim_in = x.shape
    dim_out = weight.shape[0]

    # Lane-dense feature tiling: TN is a multiple of 128; pad dim_out up to a
    # multiple of TN and slice the pad off at the end.
    tn = min(tn, _round_up(dim_out, 128))
    dp = _round_up(dim_out, tn)
    grid = (dp // tn,)

    if dp != dim_out:
        pad = dp - dim_out
        weight = jnp.pad(weight, ((0, pad), (0, 0)))  # zero rows -> zero output, sliced off
        gamma = jnp.pad(gamma, (0, pad))
        beta = jnp.pad(beta, (0, pad))
    g2 = gamma.reshape(1, dp).astype(jnp.float32)
    be2 = beta.reshape(1, dp).astype(jnp.float32)

    if matmul_dtype is not None:
        x_mm = x.astype(matmul_dtype)
        w_mm = weight.astype(matmul_dtype)
    else:
        x_mm, w_mm = x, weight

    # TODO(synk): if N grows so large that an (N, TN) f32 tile no longer fits VMEM,
    # switch BN to a single-pass sum/sum-of-squares accumulation over a trailing
    # "arbitrary" batch grid axis (per-tile mean/var would be silently wrong).
    # TODO(synk): PyTorch BatchNorm1d also updates running_mean/running_var in
    # training mode; that stateful side effect is not implemented here.
    out = pl.pallas_call(
        ignore_linear_kernel,
        out_shape=jax.ShapeDtypeStruct((n, dp), x.dtype),
        grid_spec=pltpu.PrefetchScalarGridSpec(
            num_scalar_prefetch=0,
            grid=grid,
            in_specs=[
                # x: constant block index -> fetched once, resident across all tiles.
                pl.BlockSpec((n, dim_in), lambda j: (0, 0)),
                # W tile: (TN, dim_in) slice of the untransposed weight.
                pl.BlockSpec((tn, dim_in), lambda j: (j, 0)),
                pl.BlockSpec((1, tn), lambda j: (0, j)),
                pl.BlockSpec((1, tn), lambda j: (0, j)),
            ],
            out_specs=pl.BlockSpec((n, tn), lambda j: (0, j)),
        ),
        compiler_params=pltpu.CompilerParams(
            # Feature tiles are independent -> megacore sharding on v7x; harmless on v5e/v6e.
            dimension_semantics=("parallel",),
            # Above the 16/32 MiB default scoped cap, within v7x's 64 MiB physical VMEM.
            vmem_limit_bytes=48 * 1024 * 1024,
        ),
    )(x_mm, w_mm, g2, be2)

    if dp != dim_out:
        out = out[:, :dim_out]
    return out


if __name__ == "__main__":
    # Small shapes consistent with the module: x is (batch, dim_in)
    batch, dim_in, dim_out = 8, 32, 16

    key = jax.random.PRNGKey(0)
    kx, kw, kb = jax.random.split(key, 3)

    x = jax.random.normal(kx, (batch, dim_in), dtype=jnp.float32)
    t = jnp.float32(0.0)  # ignored, matches IgnoreLinear.forward signature

    # Deterministic parameter init (nn.Linear-style uniform bound; BN: weight=1, bias=0)
    bound = 1.0 / (dim_in ** 0.5)
    weight = jax.random.uniform(kw, (dim_out, dim_in), jnp.float32, -bound, bound)
    bias = jax.random.uniform(kb, (dim_out,), jnp.float32, -bound, bound)
    gamma = jnp.ones((dim_out,), jnp.float32)
    beta = jnp.zeros((dim_out,), jnp.float32)

    out = ignore_linear(t, x, weight, bias, gamma, beta)
    out = jax.block_until_ready(out)

    # Sanity check against plain-JAX reference with the FULL module semantics
    # (bias included; it cancels under training-mode BN up to rounding).
    y_ref = x @ weight.T + bias
    m = y_ref.mean(axis=0)
    v = ((y_ref - m) ** 2).mean(axis=0)
    ref = (y_ref - m) / jnp.sqrt(v + BN_EPS) * gamma + beta
    assert out.shape == (batch, dim_out)
    assert jnp.allclose(out, ref, atol=1e-5, rtol=1e-5), "mismatch vs reference"

    print("KERNEL_OK")
</pallas_src>

<mosaic_0001>
module attributes {stable_mosaic.version = 11 : i64} {
  func.func @ignore_linear_kernel(%arg0: i32, %arg1: memref<8x32xf32, #tpu.memory_space<vmem>>, %arg2: memref<128x32xf32, #tpu.memory_space<vmem>>, %arg3: memref<1x128xf32, #tpu.memory_space<vmem>>, %arg4: memref<1x128xf32, #tpu.memory_space<vmem>>, %arg5: memref<8x128xf32, #tpu.memory_space<vmem>>) attributes {dimension_semantics = [#tpu.dimension_semantics<parallel>], iteration_bounds = array<i64: 1>, scalar_prefetch = 0 : i64, scratch_operands = 0 : i64, tpu.core_type = #tpu.core_type<tc>, window_params = [{pipeline_mode = #tpu.pipeline_mode<synchronous>, transform_indices = @transform_0, window_bounds = array<i64: 8, 32>}, {transform_indices = @transform_1, window_bounds = array<i64: 128, 32>}, {transform_indices = @transform_2, window_bounds = array<i64: 1, 128>}, {transform_indices = @transform_3, window_bounds = array<i64: 1, 128>}, {transform_indices = @transform_4, window_bounds = array<i64: 8, 128>}]} {
    %c0 = arith.constant 0 : index
    %c0_0 = arith.constant 0 : index
    %0 = vector.load %arg1[%c0, %c0_0] : memref<8x32xf32, #tpu.memory_space<vmem>>, vector<8x32xf32>
    %c0_1 = arith.constant 0 : index
    %c0_2 = arith.constant 0 : index
    %1 = vector.load %arg2[%c0_1, %c0_2] : memref<128x32xf32, #tpu.memory_space<vmem>>, vector<128x32xf32>
    %cst = arith.constant dense<0.000000e+00> : vector<8x128xf32>
    %2 = tpu.matmul %0, %1, %cst {dimension_numbers = #tpu.dot_dimension_numbers<[1], [1], [0], [0], [0, 0, 1, 0], [], []>} : vector<8x32xf32>, vector<128x32xf32>, vector<8x128xf32> -> vector<8x128xf32>
    %cst_3 = arith.constant dense<0.000000e+00> : vector<128xf32>
    %3 = vector.multi_reduction <add>, %2, %cst_3 [0] : vector<8x128xf32> to vector<128xf32>
    %4 = vector.shape_cast %3 : vector<128xf32> to vector<1x128xf32>
    %cst_4 = arith.constant 8.000000e+00 : f32
    %5 = vector.broadcast %cst_4 : f32 to vector<1x128xf32>
    %6 = arith.divf %4, %5 : vector<1x128xf32>
    %7 = vector.broadcast %6 : vector<1x128xf32> to vector<8x128xf32>
    %8 = arith.subf %2, %7 : vector<8x128xf32>
    %9 = arith.mulf %8, %8 : vector<8x128xf32>
    %cst_5 = arith.constant dense<0.000000e+00> : vector<128xf32>
    %10 = vector.multi_reduction <add>, %9, %cst_5 [0] : vector<8x128xf32> to vector<128xf32>
    %11 = vector.shape_cast %10 : vector<128xf32> to vector<1x128xf32>
    %cst_6 = arith.constant 8.000000e+00 : f32
    %12 = vector.broadcast %cst_6 : f32 to vector<1x128xf32>
    %13 = arith.divf %11, %12 : vector<1x128xf32>
    %cst_7 = arith.constant 9.99999974E-6 : f32
    %14 = vector.broadcast %cst_7 : f32 to vector<1x128xf32>
    %15 = arith.addf %13, %14 : vector<1x128xf32>
    %16 = math.rsqrt %15 : vector<1x128xf32>
    %c0_8 = arith.constant 0 : index
    %c0_9 = arith.constant 0 : index
    %17 = vector.load %arg3[%c0_8, %c0_9] : memref<1x128xf32, #tpu.memory_space<vmem>>, vector<1x128xf32>
    %18 = arith.mulf %16, %17 : vector<1x128xf32>
    %19 = vector.broadcast %18 : vector<1x128xf32> to vector<8x128xf32>
    %20 = arith.mulf %8, %19 : vector<8x128xf32>
    %c0_10 = arith.constant 0 : index
    %c0_11 = arith.constant 0 : index
    %21 = vector.load %arg4[%c0_10, %c0_11] : memref<1x128xf32, #tpu.memory_space<vmem>>, vector<1x128xf32>
    %22 = vector.broadcast %21 : vector<1x128xf32> to vector<8x128xf32>
    %23 = arith.addf %20, %22 : vector<8x128xf32>
    %c0_12 = arith.constant 0 : index
    %c0_13 = arith.constant 0 : index
    %24 = vector.load %arg5[%c0_12, %c0_13] : memref<8x128xf32, #tpu.memory_space<vmem>>, vector<8x128xf32>
    tpu.vector_store %arg5[%c0_12, %c0_13], %23 {strides = array<i32>} : memref<8x128xf32, #tpu.memory_space<vmem>>, vector<8x128xf32>,
    return
  }
  func.func @transform_0(%arg0: i32) -> (i32, i32) {
    %c0_i32 = arith.constant 0 : i32
    %c0_i32_0 = arith.constant 0 : i32
    %c0_i32_1 = arith.constant 0 : i32
    return %c0_i32, %c0_i32_0 : i32, i32
  }
  func.func @transform_1(%arg0: i32) -> (i32, i32) {
    %c0_i32 = arith.constant 0 : i32
    %c0_i32_0 = arith.constant 0 : i32
    return %arg0, %c0_i32 : i32, i32
  }
  func.func @transform_2(%arg0: i32) -> (i32, i32) {
    %c0_i32 = arith.constant 0 : i32
    %c0_i32_0 = arith.constant 0 : i32
    return %c0_i32, %arg0 : i32, i32
  }
  func.func @transform_3(%arg0: i32) -> (i32, i32) {
    %c0_i32 = arith.constant 0 : i32
    %c0_i32_0 = arith.constant 0 : i32
    return %c0_i32, %arg0 : i32, i32
  }
  func.func @transform_4(%arg0: i32) -> (i32, i32) {
    %c0_i32 = arith.constant 0 : i32
    %c0_i32_0 = arith.constant 0 : i32
    return %c0_i32, %arg0 : i32, i32
  }
}

</mosaic_0001>

<bundles_post_ra>
// kernel: tpu_custom_call.1
= control target key start
LH: loop header
LB: loop body
LE: loop exit
PB: predicated region body
PF: predicated region fallthrough
CT: control target
= control target key end

     0   :  { %vm35_vm0 = vcmask 261120   ;;  %v303_v1 = vmov 0.0   ;;  %vm304_vm1 = vmmov 0   ;;  %s408_s0 = inlined_call_operand.vmem [shape: f32[8,32], index: 0, kind: input, shape index: {}]   ;;  %s409_s1 = inlined_call_operand.vmem [shape: f32[128,32], index: 1, kind: input, shape index: {}]   ;;  %s410_s2 = inlined_call_operand.vmem [shape: f32[1,128], index: 2, kind: input, shape index: {}]   ;;  %s411_s3 = inlined_call_operand.vmem [shape: f32[1,128], index: 3, kind: input, shape index: {}]   ;;  %s412_s4 = inlined_call_operand.hbm [shape: f32[8,128], index: 4, kind: output, shape index: {}]  }
   0x1   :  { %v34_v0 = vld [vmem:[%s409_s1 + $0x78] sm:$0xff]  ;;  %241 = vmatprep.subr.mxu0 %v303_v1  ;;  %273 = vmatprep.mubr.msk.f32.mxu0 %vm304_vm1, %v303_v1  ;;  %v33_v2 = vld [vmem:[%s409_s1 + $0x70] sm:$0xff] }
   0x2   :  { %242 = vmatpush3.xpose.msk.msra.mxu0 %vm35_vm0, %v34_v0 }
   0x3   :  { %243 = vmatprep.subr.mxu0 %v303_v1 }
   0x4   :  { %9 = vsyncpa [#allocation3], 0  ;;  %v32_v3 = vld [vmem:[%s409_s1 + $0x68] sm:$0xff]  ;;  %v31_v4 = vld [vmem:[%s409_s1 + $0x60] sm:$0xff]  ;;  %v178_v37 = vlaneseq  ;;  %s305_s25 = smov [#allocation2]  }
   0x5   :  { %v30_v5 = vld [vmem:[%s409_s1 + $0x58] sm:$0xff]  ;;  %v29_v6 = vld [vmem:[%s409_s1 + $0x50] sm:$0xff]  ;;  %v28_v7 = vld [vmem:[%s409_s1 + $0x48] sm:$0xff]  ;;  %s198_s26 = sshll.u32 %s305_s25, 4  ;;  %s199_s26 = int_to_ptr.vmem [resolvable:$true] %s198_s26 }
   0x6   :  { %244 = vmatpush3.xpose.msk.msra.mxu0 %vm35_vm0, %v33_v2  ;;  %v27_v8 = vld [vmem:[%s409_s1 + $0x40] sm:$0xff]  ;;  %v26_v9 = vld [vmem:[%s409_s1 + $0x38] sm:$0xff]  ;;  %v25_v10 = vld [vmem:[%s409_s1 + $0x30] sm:$0xff]  ;;  %v179_v38 = vshrl.u32 %v178_v37, 7  ;;  %s281_s27 = scalar_lea.vmem %s199_s26, 128  ;;  %p286_p1 = scmp.lt.s32.totalorder %s199_s26, %s199_s26 }
   0x7   :  { %245 = vmatprep.subr.mxu0 %v303_v1  ;;  %v24_v11 = vld [vmem:[%s409_s1 + $0x28] sm:$0xff]  ;;  %v23_v12 = vld [vmem:[%s409_s1 + $0x20] sm:$0xff]  ;;  %v22_v13 = vld [vmem:[%s409_s1 + $0x18] sm:$0xff]  ;;  %p282_p0 = scmp.ne.s32.totalorder %s199_s26, %s281_s27  ;;  %p287_p2 = scmp.lt.s32.totalorder %s281_s27, %s281_s27 }
   0x8   :  { %v21_v14 = vld [vmem:[%s409_s1 + $0x10] sm:$0xff]  ;;  %v20_v15 = vld [vmem:[%s409_s1 + $0x8] sm:$0xff]  ;;  %v19_v16 = vld [vmem:[%s409_s1] sm:$0xff]  ;;  %v180_v40 = vsub.s32 0, %v179_v38 }
   0x9   :  { %v18_v17 = vld [vmem:[%s408_s0] sm:$0xff]  ;;  %p288_p3 = por %p287_p2, %p286_p1 }
   0xa   :  { %246 = vmatpush3.xpose.msk.msra.mxu0 %vm35_vm0, %v32_v3  ;;  %v176_v39 = vld [vmem:[%s410_s2] sm:$0x1] }
   0xb   :  { %247 = vmatprep.subr.mxu0 %v303_v1  ;;  %v223_v44 = vld [vmem:[%s411_s3] ss:$0 sm:$0xff]  ;;  %p289_p4 = pnand %p288_p3, %p282_p0 }
   0xe   :  { %248 = vmatpush3.xpose.msk.msra.mxu0 %vm35_vm0, %v31_v4 }
   0xf   :  { %249 = vmatprep.subr.mxu0 %v303_v1 }
  0x12   :  { %250 = vmatpush3.xpose.msk.msra.mxu0 %vm35_vm0, %v30_v5 }
  0x13   :  { %251 = vmatprep.subr.mxu0 %v303_v1 }
  0x16   :  { %252 = vmatpush3.xpose.msk.msra.mxu0 %vm35_vm0, %v29_v6 }
  0x17   :  { %253 = vmatprep.subr.mxu0 %v303_v1 }
  0x1a   :  { %254 = vmatpush3.xpose.msk.msra.mxu0 %vm35_vm0, %v28_v7 }
  0x1b   :  { %255 = vmatprep.subr.mxu0 %v303_v1 }
  0x1e   :  { %256 = vmatpush3.xpose.msk.msra.mxu0 %vm35_vm0, %v27_v8 }
  0x1f   :  { %257 = vmatprep.subr.mxu0 %v303_v1 }
  0x22   :  { %258 = vmatpush3.xpose.msk.msra.mxu0 %vm35_vm0, %v26_v9 }
  0x23   :  { %259 = vmatprep.subr.mxu0 %v303_v1 }
  0x26   :  { %260 = vmatpush3.xpose.msk.msra.mxu0 %vm35_vm0, %v25_v10 }
  0x27   :  { %261 = vmatprep.subr.mxu0 %v303_v1 }
  0x2a   :  { %262 = vmatpush3.xpose.msk.msra.mxu0 %vm35_vm0, %v24_v11 }
  0x2b   :  { %263 = vmatprep.subr.mxu0 %v303_v1 }
  0x2e   :  { %264 = vmatpush3.xpose.msk.msra.mxu0 %vm35_vm0, %v23_v12 }
  0x2f   :  { %265 = vmatprep.subr.mxu0 %v303_v1 }
  0x32   :  { %266 = vmatpush3.xpose.msk.msra.mxu0 %vm35_vm0, %v22_v13 }
  0x33   :  { %267 = vmatprep.subr.mxu0 %v303_v1 }
  0x36   :  { %268 = vmatpush3.xpose.msk.msra.mxu0 %vm35_vm0, %v21_v14 }
  0x37   :  { %269 = vmatprep.subr.mxu0 %v303_v1 }
  0x3a   :  { %270 = vmatpush3.xpose.msk.msra.mxu0 %vm35_vm0, %v20_v15 }
  0x3b   :  { %271 = vmatprep.subr.mxu0 %v303_v1 }
  0x3e   :  { %272 = vmatpush3.xpose.msk.msra.mxu0 %vm35_vm0, %v19_v16 }
  0x41   :  { %274 = vmatmul.mubr.msk.f32.vlgmr.msra.gmra.mxu0 %vm35_vm0, %v18_v17 }
 0x101   :  { %v153_v18 = vpop.f32.mrf.mxu0 }
 0x102   :  { %v157_v19 = vrot.slane %v153_v18, 4 }
 0x103   :  { %v275_v20 = vpop.f32.mrf.mxu0 }
 0x104   :  { %v158_v21 = vadd.f32 %v157_v19, %v153_v18 }
 0x106   :  { %v159_v22 = vrot.slane %v158_v21, 2 }
 0x108   :  { %v160_v23 = vadd.f32 %v159_v22, %v158_v21 }
 0x10a   :  { %v161_v24 = vrot.slane %v160_v23, 1 }
 0x10c   :  { %v162_v25 = vadd.f32 %v161_v24, %v160_v23 }
 0x10e   :  { %v164_v26 = vmul.f32 0.125, %v162_v25 }
 0x110   :  { %v165_v27 = vsub.f32 %v153_v18, %v164_v26 }
 0x112   :  { %v166_v28 = vmul.f32 %v165_v27, %v165_v27 }
 0x114   :  { %v167_v29 = vrot.slane %v166_v28, 4 }
 0x116   :  { %v168_v30 = vadd.f32 %v167_v29, %v166_v28 }
 0x118   :  { %v169_v31 = vrot.slane %v168_v30, 2 }
 0x11a   :  { %v170_v32 = vadd.f32 %v169_v31, %v168_v30 }
 0x11c   :  { %v171_v33 = vrot.slane %v170_v32, 1 }
 0x11e   :  { %v172_v34 = vadd.f32 %v171_v33, %v170_v32 }
 0x120   :  { %v173_v35 = vmul.f32 0.125, %v172_v34 }
 0x122   :  { %v174_v36 = vadd.f32 1e-05, %v173_v35 }
 0x124   :  { %279 = vrsqrt.f32 %v174_v36 }
 0x131   :  { %v280_v41 = vpop.eup %279 }
 0x132   :  { %v177_v42 = vmul.f32 %v280_v41, %v176_v39 }
 0x134   :  { %v181_v43 = vrot.slane %v177_v42, %v180_v40 }
 0x136   :  { %v182_v45 = vmul.f32 %v181_v43, %v165_v27 }
 0x138   :  { %v190_v46 = vadd.f32 %v223_v44, %v182_v45 }
 0x13a   :  { %191 = vst [vmem:[#allocation2] sm:$0xff] %v190_v46 }
 0x13b   :  { %292 = shalt.err (!%p289_p4)
}
 0x13c   :  { %201 = dma.vmem_to_hbm [thread:$0]  %s199_s26, 128, %s412_s4, [#allocation3]  }
 0x13d   :  { %301 = dma.done.wait [#allocation3], 128  }
 0x13e   :  { %302 = vsyncadd [#allocation3], 4294967168 }
 0x13f   :  { %205 = vsyncpa [#allocation3], 1 }

</bundles_post_ra>
